<compile_context>
chip_gen: v5e
topology: v5e:2x2
jax: 0.10.0
libtpu: 0.0.40
codegen_flags: <defaults>
</compile_context>

<pallas_src>
import jax
import jax.numpy as jnp
from jax.experimental import pallas as pl
from jax.experimental.pallas import tpu as pltpu


def _r2_partials_kernel(shift_ref, pred_ref, real_ref, out_ref, acc_ref):
    """Accumulate per-lane partial sums into a VMEM accumulator.

    acc_ref is (3, 1, LANES) f32:
      acc[0] = sum over rows of (real - pred)^2
      acc[1] = sum over rows of (real - shift)
      acc[2] = sum over rows of (real - shift)^2
    """
    i = pl.program_id(1)  # inner "arbitrary" axis: accumulation steps

    @pl.when(i == 0)
    def _init():
        acc_ref[...] = jnp.zeros_like(acc_ref)

    shift = shift_ref[0]
    pred = pred_ref[...].astype(jnp.float32)
    real = real_ref[...].astype(jnp.float32)

    diff = real - pred        # exactly 0 on padded rows
    rc = real - shift         # centered real; exactly 0 on padded rows

    # Sublane-axis reductions keep per-lane partials: the hot loop stays on
    # the VPU, with no per-step SMEM scalar read-modify-write dependency.
    acc_ref[0] += jnp.sum(diff * diff, axis=0, keepdims=True)
    acc_ref[1] += jnp.sum(rc, axis=0, keepdims=True)
    acc_ref[2] += jnp.sum(rc * rc, axis=0, keepdims=True)

    @pl.when(i == pl.num_programs(1) - 1)
    def _finalize():
        out_ref[0] = acc_ref[...]


def r2_loss(pred, real, *, lanes=512, max_block_elems=512 * 1024, ncores=2):
    """loss = 1 - r2_score(pred, real), streamed through a Pallas TPU kernel."""
    assert pred.shape == real.shape, "pred/real must have the same shape"
    n = 1
    for d in pred.shape:
        n *= int(d)
    assert n > 0

    pred_flat = pred.reshape(-1)
    real_flat = real.reshape(-1)

    # Data-derived centering shift: stabilizes the one-pass SS_tot formula and
    # doubles as the padding fill value (padding then contributes exactly 0).
    shift = real_flat[0].astype(jnp.float32)

    # ---- lane-dense layout & generation-safe tiling -------------------------
    rows = pl.cdiv(n, lanes)
    rows = pl.cdiv(rows, 8) * 8                                    # sublane tile
    block_rows = min(rows, max(8, (max_block_elems // lanes) // 8 * 8))
    num_blocks = pl.cdiv(rows, block_rows)
    cores = min(ncores, num_blocks)      # outer "parallel" axis (megacore, v7x)
    steps = pl.cdiv(num_blocks, cores)   # inner "arbitrary" accumulation axis
    rows = cores * steps * block_rows    # grid divides evenly after padding
    padded_n = rows * lanes

    def pad_and_tile(x_flat, dtype):
        extra = padded_n - n
        if extra:
            fill = jnp.full((extra,), shift.astype(dtype), dtype=dtype)
            x_flat = jnp.concatenate([x_flat, fill])
        return x_flat.reshape(rows, lanes)

    pred2 = pad_and_tile(pred_flat, pred.dtype)
    real2 = pad_and_tile(real_flat, real.dtype)
    shift_arr = shift.reshape(1)

    # 2 inputs x 2 pipeline buffers x block, plus headroom for in-kernel temps;
    # capped so it stays within v7x's 64 MiB physical VMEM.
    block_bytes = block_rows * lanes * jnp.dtype(pred.dtype).itemsize
    vmem_limit = int(min(56 * 1024 * 1024, 4 * block_bytes + 24 * 1024 * 1024))

    partials = pl.pallas_call(
        _r2_partials_kernel,
        out_shape=jax.ShapeDtypeStruct((cores, 3, 1, lanes), jnp.float32),
        grid_spec=pltpu.PrefetchScalarGridSpec(
            num_scalar_prefetch=0,
            grid=(cores, steps),
            in_specs=[
                pl.BlockSpec(memory_space=pltpu.SMEM),              # shift (1,)
                pl.BlockSpec((block_rows, lanes),
                             lambda c, i: (c * steps + i, 0)),      # pred
                pl.BlockSpec((block_rows, lanes),
                             lambda c, i: (c * steps + i, 0)),      # real
            ],
            out_specs=pl.BlockSpec((1, 3, 1, lanes),
                                   lambda c, i: (c, 0, 0, 0)),
            scratch_shapes=[pltpu.VMEM((3, 1, lanes), jnp.float32)],
        ),
        compiler_params=pltpu.CompilerParams(
            dimension_semantics=("parallel", "arbitrary"),
            vmem_limit_bytes=vmem_limit,
        ),
    )(shift_arr, pred2, real2)

    # Tiny final combine (cores * 3 * lanes elements) in plain JAX.
    sums = jnp.sum(partials, axis=(0, 2, 3))              # (3,)
    ss_res = sums[0]
    s1, s2 = sums[1], sums[2]
    ss_tot = s2 - (s1 * s1) / jnp.float32(n)   # == sum((real - mean(real))^2)
    # NOTE: ss_tot == 0 (constant `real`) yields inf/NaN, matching the naive
    # reference formula.
    return ss_res / ss_tot                     # == 1 - r2_score(pred, real)


if __name__ == "__main__":
    key = jax.random.PRNGKey(0)
    k1, k2 = jax.random.split(key)

    B, D = 16, 32  # small regression-style batch; D=32 exercises the lane-dense relayout
    # Nonzero mean exercises the shift-centered one-pass variance path.
    real = 3.0 + jax.random.normal(k1, (B, D), dtype=jnp.float32)
    pred = real + 0.1 * jax.random.normal(k2, (B, D), dtype=jnp.float32)

    loss = jax.block_until_ready(jax.jit(r2_loss)(pred, real))

    # Pure-JAX reference: 1 - r2_score(pred, real)
    ss_res = jnp.sum((real - pred) ** 2)
    ss_tot = jnp.sum((real - jnp.mean(real)) ** 2)
    ref = ss_res / ss_tot

    assert jnp.isfinite(loss), "kernel produced non-finite loss"
    assert jnp.allclose(loss, ref, rtol=1e-3, atol=1e-6), (loss, ref)

    print("KERNEL_OK")
</pallas_src>

<mosaic_0001>
module attributes {stable_mosaic.version = 11 : i64} {
  func.func @_r2_partials_kernel(%arg0: i32, %arg1: i32, %arg2: memref<1xf32, #tpu.memory_space<smem>>, %arg3: memref<8x512xf32, #tpu.memory_space<vmem>>, %arg4: memref<8x512xf32, #tpu.memory_space<vmem>>, %arg5: memref<1x3x1x512xf32, #tpu.memory_space<vmem>>, %arg6: memref<3x1x512xf32, #tpu.memory_space<vmem>>) attributes {dimension_semantics = [#tpu.dimension_semantics<parallel>, #tpu.dimension_semantics<arbitrary>], iteration_bounds = array<i64: 1, 1>, scalar_prefetch = 0 : i64, scratch_operands = 1 : i64, tpu.core_type = #tpu.core_type<tc>, window_params = [{transform_indices = @transform_0, window_bounds = array<i64: 1>}, {transform_indices = @transform_1, window_bounds = array<i64: 8, 512>}, {transform_indices = @transform_2, window_bounds = array<i64: 8, 512>}, {transform_indices = @transform_3, window_bounds = array<i64: 1, 3, 1, 512>}]} {
    %c0_i32 = arith.constant 0 : i32
    %0 = arith.cmpi eq, %arg1, %c0_i32 : i32
    %1 = arith.extui %0 : i1 to i32
    %c0_i32_0 = arith.constant 0 : i32
    %2 = arith.cmpi ne, %1, %c0_i32_0 : i32
    scf.if %2 {
      %cst_25 = arith.constant 0.000000e+00 : f32
      %38 = vector.broadcast %cst_25 : f32 to vector<3x1x512xf32>
      %c0_26 = arith.constant 0 : index
      %c0_27 = arith.constant 0 : index
      %c0_28 = arith.constant 0 : index
      %39 = vector.load %arg6[%c0_26, %c0_27, %c0_28] : memref<3x1x512xf32, #tpu.memory_space<vmem>>, vector<3x1x512xf32>
      tpu.vector_store %arg6[%c0_26, %c0_27, %c0_28], %38 {strides = array<i32>} : memref<3x1x512xf32, #tpu.memory_space<vmem>>, vector<3x1x512xf32>,
    } else {
    }
    %c0 = arith.constant 0 : index
    %3 = memref.load %arg2[%c0] : memref<1xf32, #tpu.memory_space<smem>>
    %c0_1 = arith.constant 0 : index
    %c0_2 = arith.constant 0 : index
    %4 = vector.load %arg3[%c0_1, %c0_2] : memref<8x512xf32, #tpu.memory_space<vmem>>, vector<8x512xf32>
    %c0_3 = arith.constant 0 : index
    %c0_4 = arith.constant 0 : index
    %5 = vector.load %arg4[%c0_3, %c0_4] : memref<8x512xf32, #tpu.memory_space<vmem>>, vector<8x512xf32>
    %6 = arith.subf %5, %4 : vector<8x512xf32>
    %7 = vector.broadcast %3 : f32 to vector<8x512xf32>
    %8 = arith.subf %5, %7 : vector<8x512xf32>
    %c0_5 = arith.constant 0 : index
    %c0_6 = arith.constant 0 : index
    %c0_7 = arith.constant 0 : index
    %9 = vector.load %arg6[%c0_5, %c0_6, %c0_7] : memref<3x1x512xf32, #tpu.memory_space<vmem>>, vector<1x1x512xf32>
    %10 = vector.shape_cast %9 : vector<1x1x512xf32> to vector<1x512xf32>
    %11 = arith.mulf %6, %6 : vector<8x512xf32>
    %cst = arith.constant dense<0.000000e+00> : vector<512xf32>
    %12 = vector.multi_reduction <add>, %11, %cst [0] : vector<8x512xf32> to vector<512xf32>
    %13 = vector.shape_cast %12 : vector<512xf32> to vector<1x512xf32>
    %14 = arith.addf %10, %13 : vector<1x512xf32>
    %c0_8 = arith.constant 0 : index
    %c0_9 = arith.constant 0 : index
    %c0_10 = arith.constant 0 : index
    %15 = vector.load %arg6[%c0_8, %c0_9, %c0_10] : memref<3x1x512xf32, #tpu.memory_space<vmem>>, vector<1x1x512xf32>
    %16 = vector.shape_cast %15 : vector<1x1x512xf32> to vector<1x512xf32>
    %17 = vector.shape_cast %14 : vector<1x512xf32> to vector<1x1x512xf32>
    tpu.vector_store %arg6[%c0_8, %c0_9, %c0_10], %17 {strides = array<i32>} : memref<3x1x512xf32, #tpu.memory_space<vmem>>, vector<1x1x512xf32>,
    %c1 = arith.constant 1 : index
    %c0_11 = arith.constant 0 : index
    %c0_12 = arith.constant 0 : index
    %18 = vector.load %arg6[%c1, %c0_11, %c0_12] : memref<3x1x512xf32, #tpu.memory_space<vmem>>, vector<1x1x512xf32>
    %19 = vector.shape_cast %18 : vector<1x1x512xf32> to vector<1x512xf32>
    %cst_13 = arith.constant dense<0.000000e+00> : vector<512xf32>
    %20 = vector.multi_reduction <add>, %8, %cst_13 [0] : vector<8x512xf32> to vector<512xf32>
    %21 = vector.shape_cast %20 : vector<512xf32> to vector<1x512xf32>
    %22 = arith.addf %19, %21 : vector<1x512xf32>
    %c1_14 = arith.constant 1 : index
    %c0_15 = arith.constant 0 : index
    %c0_16 = arith.constant 0 : index
    %23 = vector.load %arg6[%c1_14, %c0_15, %c0_16] : memref<3x1x512xf32, #tpu.memory_space<vmem>>, vector<1x1x512xf32>
    %24 = vector.shape_cast %23 : vector<1x1x512xf32> to vector<1x512xf32>
    %25 = vector.shape_cast %22 : vector<1x512xf32> to vector<1x1x512xf32>
    tpu.vector_store %arg6[%c1_14, %c0_15, %c0_16], %25 {strides = array<i32>} : memref<3x1x512xf32, #tpu.memory_space<vmem>>, vector<1x1x512xf32>,
    %c2 = arith.constant 2 : index
    %c0_17 = arith.constant 0 : index
    %c0_18 = arith.constant 0 : index
    %26 = vector.load %arg6[%c2, %c0_17, %c0_18] : memref<3x1x512xf32, #tpu.memory_space<vmem>>, vector<1x1x512xf32>
    %27 = vector.shape_cast %26 : vector<1x1x512xf32> to vector<1x512xf32>
    %28 = arith.mulf %8, %8 : vector<8x512xf32>
    %cst_19 = arith.constant dense<0.000000e+00> : vector<512xf32>
    %29 = vector.multi_reduction <add>, %28, %cst_19 [0] : vector<8x512xf32> to vector<512xf32>
    %30 = vector.shape_cast %29 : vector<512xf32> to vector<1x512xf32>
    %31 = arith.addf %27, %30 : vector<1x512xf32>
    %c2_20 = arith.constant 2 : index
    %c0_21 = arith.constant 0 : index
    %c0_22 = arith.constant 0 : index
    %32 = vector.load %arg6[%c2_20, %c0_21, %c0_22] : memref<3x1x512xf32, #tpu.memory_space<vmem>>, vector<1x1x512xf32>
    %33 = vector.shape_cast %32 : vector<1x1x512xf32> to vector<1x512xf32>
    %34 = vector.shape_cast %31 : vector<1x512xf32> to vector<1x1x512xf32>
    tpu.vector_store %arg6[%c2_20, %c0_21, %c0_22], %34 {strides = array<i32>} : memref<3x1x512xf32, #tpu.memory_space<vmem>>, vector<1x1x512xf32>,
    %c0_i32_23 = arith.constant 0 : i32
    %35 = arith.cmpi eq, %arg1, %c0_i32_23 : i32
    %36 = arith.extui %35 : i1 to i32
    %c0_i32_24 = arith.constant 0 : i32
    %37 = arith.cmpi ne, %36, %c0_i32_24 : i32
    scf.if %37 {
      %c0_25 = arith.constant 0 : index
      %c0_26 = arith.constant 0 : index
      %c0_27 = arith.constant 0 : index
      %38 = vector.load %arg6[%c0_25, %c0_26, %c0_27] : memref<3x1x512xf32, #tpu.memory_space<vmem>>, vector<3x1x512xf32>
      %c0_28 = arith.constant 0 : index
      %c0_29 = arith.constant 0 : index
      %c0_30 = arith.constant 0 : index
      %c0_31 = arith.constant 0 : index
      %39 = vector.load %arg5[%c0_28, %c0_29, %c0_30, %c0_31] : memref<1x3x1x512xf32, #tpu.memory_space<vmem>>, vector<1x3x1x512xf32>
      %40 = vector.shape_cast %39 : vector<1x3x1x512xf32> to vector<3x1x512xf32>
      %41 = vector.shape_cast %38 : vector<3x1x512xf32> to vector<1x3x1x512xf32>
      tpu.vector_store %arg5[%c0_28, %c0_29, %c0_30, %c0_31], %41 {strides = array<i32>} : memref<1x3x1x512xf32, #tpu.memory_space<vmem>>, vector<1x3x1x512xf32>,
    } else {
    }
    return
  }
  func.func @transform_0(%arg0: i32, %arg1: i32) -> i32 {
    %c0_i32 = arith.constant 0 : i32
    %c0_i32_0 = arith.constant 0 : i32
    return %c0_i32 : i32
  }
  func.func @transform_1(%arg0: i32, %arg1: i32) -> (i32, i32) {
    %c1_i32 = arith.constant 1 : i32
    %0 = arith.muli %arg0, %c1_i32 : i32
    %1 = arith.addi %0, %arg1 : i32
    %c0_i32 = arith.constant 0 : i32
    %c0_i32_0 = arith.constant 0 : i32
    return %1, %c0_i32 : i32, i32
  }
  func.func @transform_2(%arg0: i32, %arg1: i32) -> (i32, i32) {
    %c1_i32 = arith.constant 1 : i32
    %0 = arith.muli %arg0, %c1_i32 : i32
    %1 = arith.addi %0, %arg1 : i32
    %c0_i32 = arith.constant 0 : i32
    %c0_i32_0 = arith.constant 0 : i32
    return %1, %c0_i32 : i32, i32
  }
  func.func @transform_3(%arg0: i32, %arg1: i32) -> (i32, i32, i32, i32) {
    %c0_i32 = arith.constant 0 : i32
    %c0_i32_0 = arith.constant 0 : i32
    %c0_i32_1 = arith.constant 0 : i32
    %c0_i32_2 = arith.constant 0 : i32
    return %arg0, %c0_i32, %c0_i32_0, %c0_i32_1 : i32, i32, i32, i32
  }
}

</mosaic_0001>

<bundles_post_ra>
// kernel: r2_loss.1
= control target key start
LH: loop header
LB: loop body
LE: loop exit
PB: predicated region body
PF: predicated region fallthrough
CT: control target
= control target key end

     0   :  { %v59_v0 = vlaneseq  ;;  %v241_v9 = vmov 0.0   ;;  %vm120_vm1 = vcmask 1040384   ;;  %vm122_vm2 = vcmask 1042434   ;;  %s347_s1 = inlined_call_operand.vmem [shape: f32[8,512], index: 1, kind: input, shape index: {}]   ;;  %s348_s2 = inlined_call_operand.vmem [shape: f32[8,512], index: 2, kind: input, shape index: {}]   ;;  %s349_s0 = inlined_call_operand.<no memory space> [shape: f32[1], index: 0, kind: input, shape index: {}]   ;;  %s350_s3 = inlined_call_operand.vmem [shape: f32[1,3,1,512], index: 3, kind: output, shape index: {}]  }
   0x1   :  { %v67_v1 = vld [vmem:[%s347_s1] sm:$0xff]  ;;  %v68_v2 = vld [vmem:[%s347_s1 + $0x8] sm:$0xff]  ;;  %v69_v3 = vld [vmem:[%s347_s1 + $0x10] sm:$0xff]  ;;  %v79_v4 = vstv %s349_s0  ;;  %vm124_vm3 = vcmask 1041408  }
   0x2   :  { %vm274_vm0 = vcmp.lt.s32.totalorder %v59_v0, 512  ;;  %v70_v6 = vld [vmem:[%s347_s1 + $0x18] sm:$0xff]  ;;  %v71_v7 = vld [vmem:[%s348_s2] sm:$0xff]  ;;  %v72_v8 = vld [vmem:[%s348_s2 + $0x8] sm:$0xff] }
   0x3   :  { %63 = vst.msk [vmem:[#allocation2] sm:$0xf] %vm274_vm0, %v241_v9  ;;  %v73_v10 = vld [vmem:[%s348_s2 + $0x10] sm:$0xff]  ;;  %v74_v11 = vld [vmem:[%s348_s2 + $0x18] sm:$0xff]  ;;  %v75_v12 = vsub.f32 %v71_v7, %v67_v1  ;;  %v76_v13 = vsub.f32 %v72_v8, %v68_v2  ;;  %v80_v14 = vsub.f32 %v71_v7, %v79_v4  ;;  %v295_v15 = vsub.f32 %v72_v8, %v79_v4 }
   0x4   :  { %64 = vst.msk [vmem:[#allocation2 + $0x4] sm:$0xf] %vm274_vm0, %v241_v9  ;;  %v77_v16 = vsub.f32 %v73_v10, %v69_v3  ;;  %v78_v17 = vsub.f32 %v74_v11, %v70_v6  ;;  %v299_v18 = vsub.f32 %v73_v10, %v79_v4  ;;  %v301_v19 = vsub.f32 %v74_v11, %v79_v4 }
   0x5   :  { %65 = vst.msk [vmem:[#allocation2 + $0x8] sm:$0xf] %vm274_vm0, %v241_v9  ;;  %v85_v20 = vmul.f32 %v75_v12, %v75_v12  ;;  %v86_v21 = vmul.f32 %v76_v13, %v76_v13  ;;  %v135_v22 = vrot.slane %v80_v14, 4  ;;  %v141_v23 = vrot.slane %v295_v15, 4 }
   0x6   :  { %v87_v24 = vmul.f32 %v77_v16, %v77_v16  ;;  %v88_v25 = vmul.f32 %v78_v17, %v78_v17  ;;  %v147_v26 = vrot.slane %v299_v18, 4  ;;  %v153_v27 = vrot.slane %v301_v19, 4 }
   0x7   :  { %v89_v28 = vrot.slane %v85_v20, 4  ;;  %v95_v29 = vrot.slane %v86_v21, 4  ;;  %v136_v30 = vadd.f32 %v135_v22, %v80_v14  ;;  %v142_v31 = vadd.f32 %v141_v23, %v295_v15 }
   0x8   :  { %v101_v32 = vrot.slane %v87_v24, 4  ;;  %v107_v33 = vrot.slane %v88_v25, 4  ;;  %v148_v34 = vadd.f32 %v147_v26, %v299_v18  ;;  %v154_v35 = vadd.f32 %v153_v27, %v301_v19 }
   0x9   :  { %v90_v36 = vadd.f32 %v89_v28, %v85_v20  ;;  %v96_v37 = vadd.f32 %v95_v29, %v86_v21  ;;  %v137_v38 = vrot.slane %v136_v30, 2  ;;  %v143_v39 = vrot.slane %v142_v31, 2 }
   0xa   :  { %v102_v40 = vadd.f32 %v101_v32, %v87_v24  ;;  %v108_v41 = vadd.f32 %v107_v33, %v88_v25  ;;  %v149_v42 = vrot.slane %v148_v34, 2  ;;  %v155_v43 = vrot.slane %v154_v35, 2  ;;  %v84_v25 = vld [vmem:[#allocation2] sm:$0xf] }
   0xb   :  { %v91_v44 = vrot.slane %v90_v36, 2  ;;  %v97_v45 = vrot.slane %v96_v37, 2  ;;  %v138_v46 = vadd.f32 %v137_v38, %v136_v30  ;;  %v144_v47 = vadd.f32 %v143_v39, %v142_v31  ;;  %v134_v16 = vld [vmem:[#allocation2 + $0x4] sm:$0xf] }
   0xc   :  { %v103_v48 = vrot.slane %v102_v40, 2  ;;  %v109_v49 = vrot.slane %v108_v41, 2  ;;  %v150_v50 = vadd.f32 %v149_v42, %v148_v34  ;;  %v156_v51 = vadd.f32 %v155_v43, %v154_v35 }
   0xd   :  { %v92_v52 = vadd.f32 %v91_v44, %v90_v36  ;;  %v98_v53 = vadd.f32 %v97_v45, %v96_v37  ;;  %v139_v54 = vrot.slane %v138_v46, 1  ;;  %v145_v55 = vrot.slane %v144_v47, 1 }
   0xe   :  { %v104_v56 = vadd.f32 %v103_v48, %v102_v40  ;;  %v110_v57 = vadd.f32 %v109_v49, %v108_v41  ;;  %v151_v58 = vrot.slane %v150_v50, 1  ;;  %v157_v59 = vrot.slane %v156_v51, 1 }
   0xf   :  { %v93_v60 = vrot.slane %v92_v52, 1  ;;  %v99_v61 = vrot.slane %v98_v53, 1  ;;  %v140_v62 = vadd.f32 %v139_v54, %v138_v46  ;;  %v146_v63 = vadd.f32 %v145_v55, %v144_v47 }
  0x10   :  { %v105_v0 = vrot.slane %v104_v56, 1  ;;  %v111_v1 = vrot.slane %v110_v57, 1  ;;  %v152_v2 = vadd.f32 %v151_v58, %v150_v50  ;;  %v158_v3 = vadd.f32 %v157_v59, %v156_v51  ;;  %v173_v58 = vld [vmem:[#allocation2 + $0x8] sm:$0xf] }
  0x11   :  { %v94_v4 = vadd.f32 %v93_v60, %v92_v52  ;;  %v100_v6 = vadd.f32 %v99_v61, %v98_v53  ;;  %v163_v7 = vrot.slane %v146_v63, 7  ;;  %v174_v8 = vmul.f32 %v80_v14, %v80_v14 }
  0x12   :  { %v106_v9 = vadd.f32 %v105_v0, %v104_v56  ;;  %v112_v10 = vadd.f32 %v111_v1, %v110_v57  ;;  %v164_v11 = vrot.slane %v152_v2, 6  ;;  %v165_v12 = vrot.slane %v158_v3, 5 }
  0x13   :  { %v117_v13 = vrot.slane %v100_v6, 7  ;;  %v166_v17 = vsel %vm120_vm1, %v140_v62, %v163_v7  ;;  %v175_v20 = vmul.f32 %v295_v15, %v295_v15  ;;  %v176_v21 = vmul.f32 %v299_v18, %v299_v18 }
  0x14   :  { %v118_v22 = vrot.slane %v106_v9, 6  ;;  %v119_v23 = vrot.slane %v112_v10, 5  ;;  %v167_v24 = vsel %vm122_vm2, %v164_v11, %v165_v12  ;;  %v177_v14 = vmul.f32 %v301_v19, %v301_v19 }
  0x15   :  { %v121_v26 = vsel %vm120_vm1, %v94_v4, %v117_v13  ;;  %v168_v27 = vsel %vm124_vm3, %v166_v17, %v167_v24  ;;  %v178_v28 = vrot.slane %v174_v8, 4  ;;  %v184_v29 = vrot.slane %v175_v20, 4 }
  0x16   :  { %v123_v30 = vsel %vm122_vm2, %v118_v22, %v119_v23  ;;  %v170_v15 = vadd.f32 %v168_v27, %v134_v16  ;;  %v190_v31 = vrot.slane %v176_v21, 4  ;;  %v196_v32 = vrot.slane %v177_v14, 4 }
  0x17   :  { %v125_v18 = vsel %vm124_vm3, %v121_v26, %v123_v30  ;;  %v179_v33 = vadd.f32 %v178_v28, %v174_v8  ;;  %v185_v34 = vadd.f32 %v184_v29, %v175_v20 }
  0x18   :  { %v127_v35 = vadd.f32 %v125_v18, %v84_v25  ;;  %171 = vst.msk [vmem:[#allocation2 + $0x4] sm:$0xf] %vm274_vm0, %v170_v15  ;;  %v191_v19 = vadd.f32 %v190_v31, %v176_v21  ;;  %v197_v36 = vadd.f32 %v196_v32, %v177_v14 }
  0x19   :  { %v180_v37 = vrot.slane %v179_v33, 2  ;;  %v186_v38 = vrot.slane %v185_v34, 2 }
  0x1a   :  { %132 = vst.msk [vmem:[#allocation2] sm:$0xf] %vm274_vm0, %v127_v35  ;;  %v192_v39 = vrot.slane %v191_v19, 2  ;;  %v198_v40 = vrot.slane %v197_v36, 2 }
  0x1b   :  { %v181_v41 = vadd.f32 %v180_v37, %v179_v33  ;;  %v187_v42 = vadd.f32 %v186_v38, %v185_v34 }
  0x1c   :  { %v193_v43 = vadd.f32 %v192_v39, %v191_v19  ;;  %v199_v44 = vadd.f32 %v198_v40, %v197_v36 }
  0x1d   :  { %v182_v45 = vrot.slane %v181_v41, 1  ;;  %v188_v46 = vrot.slane %v187_v42, 1 }
  0x1e   :  { %v194_v47 = vrot.slane %v193_v43, 1  ;;  %v200_v48 = vrot.slane %v199_v44, 1 }
  0x1f   :  { %v183_v49 = vadd.f32 %v182_v45, %v181_v41  ;;  %v189_v50 = vadd.f32 %v188_v46, %v187_v42  ;;  %v219_v51 = vld [vmem:[#allocation2 + $0x4] sm:$0xf] }
  0x20   :  { %v195_v52 = vadd.f32 %v194_v47, %v193_v43  ;;  %v201_v53 = vadd.f32 %v200_v48, %v199_v44  ;;  %222 = vst.msk [vmem:[%s350_s3 + $0x4] sm:$0xf] %vm274_vm0, %v219_v51 }
  0x21   :  { %v206_v54 = vrot.slane %v189_v50, 7  ;;  %v218_v55 = vld [vmem:[#allocation2] sm:$0xf] }
  0x22   :  { %v207_v56 = vrot.slane %v195_v52, 6  ;;  %v208_v57 = vrot.slane %v201_v53, 5  ;;  %221 = vst.msk [vmem:[%s350_s3] sm:$0xf] %vm274_vm0, %v218_v55 }
  0x23   :  { %v209_v59 = vsel %vm120_vm1, %v183_v49, %v206_v54 }
  0x24   :  { %v210_v60 = vsel %vm122_vm2, %v207_v56, %v208_v57 }
  0x25   :  { %v211_v61 = vsel %vm124_vm3, %v209_v59, %v210_v60 }
  0x26   :  { %v213_v62 = vadd.f32 %v211_v61, %v173_v58 }
  0x28   :  { %214 = vst.msk [vmem:[#allocation2 + $0x8] sm:$0xf] %vm274_vm0, %v213_v62 }
  0x2f   :  { %v220_v63 = vld [vmem:[#allocation2 + $0x8] sm:$0xf] }
  0x30   :  { %223 = vst.msk [vmem:[%s350_s3 + $0x8] sm:$0xf] %vm274_vm0, %v220_v63 }

</bundles_post_ra>
